<compile_context>
chip_gen: v7x
topology: tpu7x:2x2x1
jax: 0.10.0
libtpu: 0.0.40
codegen_flags: <defaults>
</compile_context>

<pallas_src>
from typing import NamedTuple

import jax
import jax.numpy as jnp
from jax.experimental import pallas as pl
from jax.experimental.pallas import tpu as pltpu

LANE = 128
SUBLANE = 8


def _round_up(n: int, m: int) -> int:
    return ((n + m - 1) // m) * m


def mlp_kernel(x_ref, w1_ref, b1_ref, w2_ref, b2_ref, w3_ref, b3_ref, o_ref):
    # x arrives pre-cast to bf16 with padded K; all matmuls are bf16 MXU
    # operands with f32 accumulation, bias-add / ReLU stay f32 on the VPU.
    h1 = jnp.dot(x_ref[...], w1_ref[...],
                 preferred_element_type=jnp.float32) + b1_ref[...]
    h1 = jnp.maximum(h1, 0.0)
    h2 = jnp.dot(h1.astype(jnp.bfloat16), w2_ref[...],
                 preferred_element_type=jnp.float32) + b2_ref[...]
    h2 = jnp.maximum(h2, 0.0)
    o_ref[...] = (
        jnp.dot(h2.astype(jnp.bfloat16), w3_ref[...],
                preferred_element_type=jnp.float32) + b3_ref[...]
    ).astype(o_ref.dtype)


class PreparedParams(NamedTuple):
    w1: jax.Array
    b1: jax.Array
    w2: jax.Array
    b2: jax.Array
    w3: jax.Array
    b3: jax.Array
    in_dim: int
    in_pad: int
    hidden_dim: int
    out_dim: int
    out_pad: int


def init_params(key, input_dim=7, hidden_dim=512, output_dim=5):
    """Deterministic synthetic init in f32, (in, out) layout."""
    k1, k2, k3, k4, k5, k6 = jax.random.split(key, 6)
    scale = 0.05
    w1 = scale * jax.random.normal(k1, (input_dim, hidden_dim), jnp.float32)
    b1 = scale * jax.random.normal(k2, (hidden_dim,), jnp.float32)
    w2 = scale * jax.random.normal(k3, (hidden_dim, hidden_dim), jnp.float32)
    b2 = scale * jax.random.normal(k4, (hidden_dim,), jnp.float32)
    w3 = scale * jax.random.normal(k5, (hidden_dim, output_dim), jnp.float32)
    b3 = scale * jax.random.normal(k6, (output_dim,), jnp.float32)
    return (w1, b1, w2, b2, w3, b3)


def prepare_params(params) -> PreparedParams:
    """One-time param prep (hoisted out of the forward hot path):
    pad fc1 K to a whole sublane, pad fc3 N to 128 lanes (lane-dense store),
    cast weights to bf16 (MXU operand dtype), keep biases f32 as (1, N)."""
    w1, b1, w2, b2, w3, b3 = params
    in_dim, hidden_dim = w1.shape
    out_dim = w3.shape[1]
    in_pad = _round_up(in_dim, SUBLANE)
    out_pad = _round_up(out_dim, LANE)

    w1p = jnp.pad(w1, ((0, in_pad - in_dim), (0, 0))).astype(jnp.bfloat16)
    w2p = w2.astype(jnp.bfloat16)
    w3p = jnp.pad(w3, ((0, 0), (0, out_pad - out_dim))).astype(jnp.bfloat16)
    b1p = jnp.asarray(b1, jnp.float32).reshape(1, hidden_dim)
    b2p = jnp.asarray(b2, jnp.float32).reshape(1, hidden_dim)
    b3p = jnp.pad(jnp.asarray(b3, jnp.float32).reshape(1, out_dim),
                  ((0, 0), (0, out_pad - out_dim)))
    return PreparedParams(w1p, b1p, w2p, b2p, w3p, b3p,
                          in_dim, in_pad, hidden_dim, out_dim, out_pad)


def uav_logistics_forward(x, prepped: PreparedParams, *, batch_tile=256,
                          out_dtype=jnp.float32):
    p = prepped
    B = x.shape[0]
    assert x.shape[1] == p.in_dim, (x.shape, p.in_dim)

    # ---- batch tiling: single grid step for small/medium batches -----------
    b_rounded = _round_up(B, SUBLANE)
    tb = b_rounded if b_rounded <= max(batch_tile, 512) else batch_tile
    Bp = _round_up(B, tb)
    num_steps = Bp // tb

    # ---- x: bf16 MXU operand, K padded to whole sublane, batch padded ------
    xp = x.astype(jnp.bfloat16)
    if Bp != B or p.in_pad != p.in_dim:
        xp = jnp.pad(xp, ((0, Bp - B), (0, p.in_pad - p.in_dim)))

    # Weights/biases: same (0, 0) block every grid step -> VMEM-resident.
    # Buffered(1): double-buffering an invariant block is wasted VMEM.
    def resident(arr):
        return pl.BlockSpec(arr.shape, lambda i: (0,) * arr.ndim,
                            pipeline_mode=pl.Buffered(1))

    # Megacore sharding only pays once per-core compute amortizes the
    # duplicated weight DMA; keep tiny grids on a single core.
    semantics = (pltpu.PARALLEL,) if num_steps >= 8 else (pltpu.ARBITRARY,)

    weight_bytes = sum(a.size * a.dtype.itemsize
                       for a in (p.w1, p.b1, p.w2, p.b2, p.w3, p.b3))
    act_bytes = tb * (2 * p.in_pad * 2          # x tile (double-buffered)
                      + 3 * p.hidden_dim * 4    # h1/h2 f32 + slack
                      + 2 * p.hidden_dim * 2    # bf16 casts of h1/h2
                      + 3 * p.out_pad * 4)      # out tile (dbl-buf) + headroom
    vmem_limit = int(min(64 * 1024 * 1024,
                         max(8 * 1024 * 1024, 2 * (weight_bytes + act_bytes))))

    out_itemsize = jnp.dtype(out_dtype).itemsize
    flops = 2 * Bp * (p.in_pad * p.hidden_dim
                      + p.hidden_dim * p.hidden_dim
                      + p.hidden_dim * p.out_pad)
    bytes_accessed = int(xp.size * xp.dtype.itemsize + weight_bytes
                         + Bp * p.out_pad * out_itemsize)

    out = pl.pallas_call(
        mlp_kernel,
        out_shape=jax.ShapeDtypeStruct((Bp, p.out_pad), out_dtype),
        grid=(num_steps,),
        in_specs=[
            pl.BlockSpec((tb, p.in_pad), lambda i: (i, 0)),   # x: batch-tiled
            resident(p.w1), resident(p.b1),
            resident(p.w2), resident(p.b2),
            resident(p.w3), resident(p.b3),
        ],
        out_specs=pl.BlockSpec((tb, p.out_pad), lambda i: (i, 0)),
        compiler_params=pltpu.CompilerParams(
            dimension_semantics=semantics,
            vmem_limit_bytes=vmem_limit,
        ),
        cost_estimate=pl.CostEstimate(
            flops=flops, transcendentals=0, bytes_accessed=bytes_accessed),
    )(xp, p.w1, p.b1, p.w2, p.b2, p.w3, p.b3)

    return out[:B, :p.out_dim].astype(jnp.float32)


def reference_forward(x, raw_params):
    """Pure-JAX reference with the same mixed precision as the kernel
    (bf16 MXU operands, f32 accumulation / elementwise)."""
    w1, b1, w2, b2, w3, b3 = raw_params

    def lin(a, w, b):
        return jnp.dot(a.astype(jnp.bfloat16), w.astype(jnp.bfloat16),
                       preferred_element_type=jnp.float32) + b.reshape(1, -1)

    h1 = jnp.maximum(lin(x, w1, b1), 0.0)
    h2 = jnp.maximum(lin(h1, w2, b2), 0.0)
    return lin(h2, w3, b3)


if __name__ == "__main__":
    key = jax.random.PRNGKey(0)
    kx, kp = jax.random.split(key)

    B, INPUT_DIM, HIDDEN_DIM, OUTPUT_DIM = 64, 7, 512, 5
    x = jax.random.normal(kx, (B, INPUT_DIM), jnp.float32)
    raw_params = init_params(kp, INPUT_DIM, HIDDEN_DIM, OUTPUT_DIM)
    prepped = prepare_params(raw_params)   # one-time prep, out of the hot path

    out = uav_logistics_forward(x, prepped)
    out = jax.block_until_ready(out)

    ref = reference_forward(x, raw_params)
    assert out.shape == (B, OUTPUT_DIM), out.shape
    assert jnp.allclose(out, ref, atol=5e-3, rtol=5e-3), "mismatch vs reference"

    print("KERNEL_OK")
</pallas_src>

<mosaic_0001>
module attributes {stable_mosaic.version = 11 : i64} {
  func.func @mlp_kernel(%arg0: i32, %arg1: memref<64x8xbf16, #tpu.memory_space<vmem>>, %arg2: memref<8x512xbf16, #tpu.memory_space<vmem>>, %arg3: memref<1x512xf32, #tpu.memory_space<vmem>>, %arg4: memref<512x512xbf16, #tpu.memory_space<vmem>>, %arg5: memref<1x512xf32, #tpu.memory_space<vmem>>, %arg6: memref<512x128xbf16, #tpu.memory_space<vmem>>, %arg7: memref<1x128xf32, #tpu.memory_space<vmem>>, %arg8: memref<64x128xf32, #tpu.memory_space<vmem>>) attributes {dimension_semantics = [#tpu.dimension_semantics<arbitrary>], iteration_bounds = array<i64: 1>, scalar_prefetch = 0 : i64, scratch_operands = 0 : i64, tpu.core_type = #tpu.core_type<tc>, window_params = [{transform_indices = @transform_0, window_bounds = array<i64: 64, 8>}, {pipeline_mode = #tpu.pipeline_mode<synchronous>, transform_indices = @transform_1, window_bounds = array<i64: 8, 512>}, {pipeline_mode = #tpu.pipeline_mode<synchronous>, transform_indices = @transform_2, window_bounds = array<i64: 1, 512>}, {pipeline_mode = #tpu.pipeline_mode<synchronous>, transform_indices = @transform_3, window_bounds = array<i64: 512, 512>}, {pipeline_mode = #tpu.pipeline_mode<synchronous>, transform_indices = @transform_4, window_bounds = array<i64: 1, 512>}, {pipeline_mode = #tpu.pipeline_mode<synchronous>, transform_indices = @transform_5, window_bounds = array<i64: 512, 128>}, {pipeline_mode = #tpu.pipeline_mode<synchronous>, transform_indices = @transform_6, window_bounds = array<i64: 1, 128>}, {transform_indices = @transform_7, window_bounds = array<i64: 64, 128>}]} {
    %c0 = arith.constant 0 : index
    %c0_0 = arith.constant 0 : index
    %0 = vector.load %arg1[%c0, %c0_0] : memref<64x8xbf16, #tpu.memory_space<vmem>>, vector<64x8xbf16>
    %c0_1 = arith.constant 0 : index
    %c0_2 = arith.constant 0 : index
    %1 = vector.load %arg2[%c0_1, %c0_2] : memref<8x512xbf16, #tpu.memory_space<vmem>>, vector<8x512xbf16>
    %cst = arith.constant dense<0.000000e+00> : vector<64x512xf32>
    %2 = tpu.matmul %0, %1, %cst {dimension_numbers = #tpu.dot_dimension_numbers<[1], [0], [0], [1], [0, 0, 1, 1], [], []>} : vector<64x8xbf16>, vector<8x512xbf16>, vector<64x512xf32> -> vector<64x512xf32>
    %c0_3 = arith.constant 0 : index
    %c0_4 = arith.constant 0 : index
    %3 = vector.load %arg3[%c0_3, %c0_4] : memref<1x512xf32, #tpu.memory_space<vmem>>, vector<1x512xf32>
    %4 = vector.broadcast %3 : vector<1x512xf32> to vector<64x512xf32>
    %5 = arith.addf %2, %4 : vector<64x512xf32>
    %cst_5 = arith.constant 0.000000e+00 : f32
    %6 = vector.broadcast %cst_5 : f32 to vector<64x512xf32>
    %7 = arith.maximumf %5, %6 : vector<64x512xf32>
    %8 = arith.truncf %7 : vector<64x512xf32> to vector<64x512xbf16>
    %c0_6 = arith.constant 0 : index
    %c0_7 = arith.constant 0 : index
    %9 = vector.load %arg4[%c0_6, %c0_7] : memref<512x512xbf16, #tpu.memory_space<vmem>>, vector<512x512xbf16>
    %cst_8 = arith.constant dense<0.000000e+00> : vector<64x512xf32>
    %10 = tpu.matmul %8, %9, %cst_8 {dimension_numbers = #tpu.dot_dimension_numbers<[1], [0], [0], [1], [0, 0, 1, 1], [], []>} : vector<64x512xbf16>, vector<512x512xbf16>, vector<64x512xf32> -> vector<64x512xf32>
    %c0_9 = arith.constant 0 : index
    %c0_10 = arith.constant 0 : index
    %11 = vector.load %arg5[%c0_9, %c0_10] : memref<1x512xf32, #tpu.memory_space<vmem>>, vector<1x512xf32>
    %12 = vector.broadcast %11 : vector<1x512xf32> to vector<64x512xf32>
    %13 = arith.addf %10, %12 : vector<64x512xf32>
    %cst_11 = arith.constant 0.000000e+00 : f32
    %14 = vector.broadcast %cst_11 : f32 to vector<64x512xf32>
    %15 = arith.maximumf %13, %14 : vector<64x512xf32>
    %16 = arith.truncf %15 : vector<64x512xf32> to vector<64x512xbf16>
    %c0_12 = arith.constant 0 : index
    %c0_13 = arith.constant 0 : index
    %17 = vector.load %arg6[%c0_12, %c0_13] : memref<512x128xbf16, #tpu.memory_space<vmem>>, vector<512x128xbf16>
    %cst_14 = arith.constant dense<0.000000e+00> : vector<64x128xf32>
    %18 = tpu.matmul %16, %17, %cst_14 {dimension_numbers = #tpu.dot_dimension_numbers<[1], [0], [0], [1], [0, 0, 1, 1], [], []>} : vector<64x512xbf16>, vector<512x128xbf16>, vector<64x128xf32> -> vector<64x128xf32>
    %c0_15 = arith.constant 0 : index
    %c0_16 = arith.constant 0 : index
    %19 = vector.load %arg7[%c0_15, %c0_16] : memref<1x128xf32, #tpu.memory_space<vmem>>, vector<1x128xf32>
    %20 = vector.broadcast %19 : vector<1x128xf32> to vector<64x128xf32>
    %21 = arith.addf %18, %20 : vector<64x128xf32>
    %c0_17 = arith.constant 0 : index
    %c0_18 = arith.constant 0 : index
    %22 = vector.load %arg8[%c0_17, %c0_18] : memref<64x128xf32, #tpu.memory_space<vmem>>, vector<64x128xf32>
    tpu.vector_store %arg8[%c0_17, %c0_18], %21 {strides = array<i32>} : memref<64x128xf32, #tpu.memory_space<vmem>>, vector<64x128xf32>,
    return
  }
  func.func @transform_0(%arg0: i32) -> (i32, i32) {
    %c0_i32 = arith.constant 0 : i32
    %c0_i32_0 = arith.constant 0 : i32
    return %arg0, %c0_i32 : i32, i32
  }
  func.func @transform_1(%arg0: i32) -> (i32, i32) {
    %c0_i32 = arith.constant 0 : i32
    %c0_i32_0 = arith.constant 0 : i32
    %c0_i32_1 = arith.constant 0 : i32
    return %c0_i32, %c0_i32_0 : i32, i32
  }
  func.func @transform_2(%arg0: i32) -> (i32, i32) {
    %c0_i32 = arith.constant 0 : i32
    %c0_i32_0 = arith.constant 0 : i32
    %c0_i32_1 = arith.constant 0 : i32
    return %c0_i32, %c0_i32_0 : i32, i32
  }
  func.func @transform_3(%arg0: i32) -> (i32, i32) {
    %c0_i32 = arith.constant 0 : i32
    %c0_i32_0 = arith.constant 0 : i32
    %c0_i32_1 = arith.constant 0 : i32
    return %c0_i32, %c0_i32_0 : i32, i32
  }
  func.func @transform_4(%arg0: i32) -> (i32, i32) {
    %c0_i32 = arith.constant 0 : i32
    %c0_i32_0 = arith.constant 0 : i32
    %c0_i32_1 = arith.constant 0 : i32
    return %c0_i32, %c0_i32_0 : i32, i32
  }
  func.func @transform_5(%arg0: i32) -> (i32, i32) {
    %c0_i32 = arith.constant 0 : i32
    %c0_i32_0 = arith.constant 0 : i32
    %c0_i32_1 = arith.constant 0 : i32
    return %c0_i32, %c0_i32_0 : i32, i32
  }
  func.func @transform_6(%arg0: i32) -> (i32, i32) {
    %c0_i32 = arith.constant 0 : i32
    %c0_i32_0 = arith.constant 0 : i32
    %c0_i32_1 = arith.constant 0 : i32
    return %c0_i32, %c0_i32_0 : i32, i32
  }
  func.func @transform_7(%arg0: i32) -> (i32, i32) {
    %c0_i32 = arith.constant 0 : i32
    %c0_i32_0 = arith.constant 0 : i32
    return %arg0, %c0_i32 : i32, i32
  }
}

</mosaic_0001>

<bundles_post_ra>
// kernel: tpu_custom_call.1
= control target key start
LH: loop header
LB: loop body
LE: loop exit
PB: predicated region body
PF: predicated region fallthrough
CT: control target
= control target key end

     0   :  { %12 = vsyncpa [#allocation3], 0  ;;  %s2797_s0 = inlined_call_operand.vmem [shape: bf16[64,8], index: 0, kind: input, shape index: {}]   ;;  %s2798_s1 = inlined_call_operand.vmem [shape: bf16[8,512], index: 1, kind: input, shape index: {}]   ;;  %s2799_s2 = inlined_call_operand.vmem [shape: f32[1,512], index: 2, kind: input, shape index: {}]   ;;  %s2800_s3 = inlined_call_operand.hbm [shape: bf16[512,512], index: 3, kind: input, shape index: {}]   ;;  %s2801_s4 = inlined_call_operand.vmem [shape: f32[1,512], index: 4, kind: input, shape index: {}]   ;;  %s2802_s5 = inlined_call_operand.hbm [shape: bf16[512,128], index: 5, kind: input, shape index: {}]   ;;  %s2803_s6 = inlined_call_operand.vmem [shape: f32[1,128], index: 6, kind: input, shape index: {}]   ;;  %s2804_s7 = inlined_call_operand.hbm [shape: f32[64,128], index: 7, kind: output, shape index: {}]  }
   0x1   :  { %13 = vsyncpa [#allocation6], 0 }
   0x2   :  { %14 = vsyncpa [#allocation4], 0  ;;  %s2524_s24 = smov [#allocation2]   ;;  %s2452_s28 = scalar_lea.hbm %s2800_s3, 16384 }
   0x3   :  { %s26_s25 = sshll.u32 %s2524_s24, 4  ;;  %p2453_p0 = scmp.ne.s32.totalorder %s2800_s3, %s2452_s28  ;;  %s27_s25 = int_to_ptr.vmem [resolvable:$true] %s26_s25 }
   0x4   :  { %p2456_p1 = scmp.lt.u32.totalorder %s2452_s28, %s2800_s3 }
   0x6   :  { %p2458_p2 = pnand %p2456_p1, %p2453_p0 }
   0x8   :  { %2461 = shalt.err (!%p2458_p2)
}
   0x9   :  { %s2462_s10 = scalar_lea.vmem %s27_s25, 16384  ;;  %p2467_p4 = scmp.lt.s32.totalorder %s27_s25, %s27_s25 }
   0xa   :  { %p2463_p3 = scmp.ne.s32.totalorder %s27_s25, %s2462_s10  ;;  %p2468_p5 = scmp.lt.s32.totalorder %s2462_s10, %s2462_s10 }
   0xc   :  { %p2469_p6 = por %p2468_p5, %p2467_p4 }
   0xe   :  { %p2470_p7 = pnand %p2469_p6, %p2463_p3 }
  0x10   :  { %2473 = shalt.err (!%p2470_p7)
}
  0x11   :  { %s2525_s11 = smov 256   ;;  %s2526_s12 = smov 16  }
  0x12   :  { %32 = dma.hbm_to_vmem [thread:$0]  %s2800_s3, 16384, %s27_s25, [#allocation3], %s2525_s11, %s2525_s11, %s2526_s12  }
  0x13   :  { %s2527_s15 = smov [#allocation5]   ;;  %s2474_s19 = scalar_lea.hbm %s2802_s5, 4096 }
  0x14   :  { %s40_s16 = sshll.u32 %s2527_s15, 4  ;;  %p2475_p8 = scmp.ne.s32.totalorder %s2802_s5, %s2474_s19  ;;  %s41_s16 = int_to_ptr.vmem [resolvable:$true] %s40_s16 }
  0x15   :  { %p2478_p9 = scmp.lt.u32.totalorder %s2474_s19, %s2802_s5 }
  0x17   :  { %p2480_p10 = pnand %p2478_p9, %p2475_p8 }
  0x19   :  { %2483 = shalt.err (!%p2480_p10)
}
  0x1a   :  { %s2484_s24 = scalar_lea.vmem %s41_s16, 4096  ;;  %p2489_p12 = scmp.lt.s32.totalorder %s41_s16, %s41_s16 }
  0x1b   :  { %p2485_p11 = scmp.ne.s32.totalorder %s41_s16, %s2484_s24  ;;  %p2490_p13 = scmp.lt.s32.totalorder %s2484_s24, %s2484_s24 }
  0x1d   :  { %p2491_p0 = por %p2490_p13, %p2489_p12 }
  0x1f   :  { %p2492_p1 = pnand %p2491_p0, %p2485_p11 }
  0x21   :  { %2495 = shalt.err (!%p2492_p1)
}
  0x22   :  { %s2528_s3 = smov 64   ;;  %s2529_s25 = smov 4  }
  0x23   :  { %46 = dma.hbm_to_vmem [thread:$0]  %s2802_s5, 4096, %s41_s16, [#allocation6], %s2528_s3, %s2528_s3, %s2529_s25  }
  0x24   :  { %2518 = dma.done.wait [#allocation3], 16384  }
  0x25   :  { %2519 = vsyncadd [#allocation3], 4294950912 }
  0x26   :  { %2520 = dma.done.wait [#allocation6], 4096  }
  0x27   :  { %2521 = vsyncadd [#allocation6], 4294963200  ;;  %v2530_v0 = vmov 0   ;;  %v64_v1 = vld [vmem:[%s2798_s1] sm:$0xff]  ;;  %vm131_vm0 = vcmask 1043456   ;;  %vm118_vm1 = vcmask 64512  }
  0x28   :  { %176 = vmatprep.mubr.bf16.mxu0 %v2530_v0  ;;  %249 = vmatprep.mubr.bf16.mxu1 %v2530_v0  ;;  %v1892_v2 = vcombine.high %v64_v1, %v64_v1  ;;  %v1891_v3 = vcombine.low %v64_v1, %v64_v1  ;;  %v2222_v5 = vld [vmem:[%s2797_s0] sm:$0xff]   ;;  %v65_v6 = vld [vmem:[%s2798_s1 + $0x8] sm:$0xff]  ;;  %v2224_v24 = vld [vmem:[%s2797_s0 + $0x10] sm:$0xff]  }
  0x29   :  { %v1894_v7 = vcombine.high %v65_v6, %v65_v6  ;;  %v1893_v8 = vcombine.low %v65_v6, %v65_v6  ;;  %v2230_v9 = vld [vmem:[#allocation2 + $0x4] ss:$16 sps:$4 sm:$0xff]   ;;  %v2228_v10 = vld [vmem:[#allocation2] ss:$16 sps:$4 sm:$0xff]   ;;  %v2233_v12 = vld [vmem:[#allocation2 + $0xc] ss:$16 sps:$4 sm:$0xff]  }
  0x2a   :  { %1895 = vmatprep.subr.msk.bf16.mxu0 %vm131_vm0, %v1892_v2  ;;  %v133_v4 = vsel %vm131_vm0, %v1891_v3, 0  ;;  %v2231_v13 = vld [vmem:[#allocation2 + $0x8] ss:$16 sps:$4 sm:$0xff]   ;;  %v2236_v14 = vld [vmem:[#allocation2 + $0x24] ss:$16 sps:$4 sm:$0xff]  }
  0x2b   :  { %145 = vmatpush1.bf16.msra.mxu0 %v133_v4  ;;  %1900 = vmatprep.subr.msk.bf16.mxu1 %vm131_vm0, %v1894_v7  ;;  %v139_v11 = vsel %vm131_vm0, %v1893_v8, 0  ;;  %v2223_v15 = vld [vmem:[%s2797_s0 + $0x8] sm:$0xff]   ;;  %v2234_v17 = vld [vmem:[#allocation2 + $0x20] ss:$16 sps:$4 sm:$0xff]   ;;  %v2242_v18 = vld [vmem:[#allocation2 + $0x44] ss:$16 sps:$4 sm:$0xff]  }
  0x2c   :  { %218 = vmatpush1.bf16.msra.mxu1 %v139_v11  ;;  %1128 = vmatprep.subr.bf16.mxu0 %v2230_v9  ;;  %v2239_v16 = vld [vmem:[#allocation2 + $0x2c] ss:$16 sps:$4 sm:$0xff]   ;;  %v2237_v19 = vld [vmem:[#allocation2 + $0x28] ss:$16 sps:$4 sm:$0xff]   ;;  %v2240_v21 = vld [vmem:[#allocation2 + $0x40] ss:$16 sps:$4 sm:$0xff]  }
  0x2d   :  { %1274 = vmatprep.subr.bf16.mxu1 %v2233_v12  ;;  %v2245_v20 = vld [vmem:[#allocation2 + $0x4c] ss:$16 sps:$4 sm:$0xff]   ;;  %v2248_v22 = vld [vmem:[#allocation2 + $0x64] ss:$16 sps:$4 sm:$0xff]   ;;  %v2243_v23 = vld [vmem:[#allocation2 + $0x48] ss:$16 sps:$4 sm:$0xff]  }
  0x2e   :  { %1896 = vmatmul.mubr.msk.bf16.vlgmr.msra.gmra.mrb[0].mxu0 %vm118_vm1, %v2222_v5  ;;  %v2251_v25 = vld [vmem:[#allocation2 + $0x6c] ss:$16 sps:$4 sm:$0xff]   ;;  %v2246_v26 = vld [vmem:[#allocation2 + $0x60] ss:$16 sps:$4 sm:$0xff]   ;;  %v2254_v27 = vld [vmem:[#allocation2 + $0x84] ss:$16 sps:$4 sm:$0xff]  }
  0x2f   :  { %186 = vmatprep.mubr.bf16.mxu0 %v2530_v0  ;;  %1129 = vmatpush1.bf16.msra.mxu0 %v2228_v10  ;;  %v2249_v28 = vld [vmem:[#allocation2 + $0x68] ss:$16 sps:$4 sm:$0xff]   ;;  %v2257_v29 = vld [vmem:[#allocation2 + $0x8c] ss:$16 sps:$4 sm:$0xff]   ;;  %v2252_v30 = vld [vmem:[#allocation2 + $0x80] ss:$16 sps:$4 sm:$0xff]  }
  0x30   :  { %1901 = vmatmul.mubr.msk.bf16.vlgmr.msra.gmra.mrb[0].mxu1 %vm118_vm1, %v2222_v5  ;;  %1130 = vmatprep.subr.bf16.mxu0 %v2236_v14  ;;  %v2260_v31 = vld [vmem:[#allocation2 + $0xa4] ss:$16 sps:$4 sm:$0xff]   ;;  %v2255_v32 = vld [vmem:[#allocation2 + $0x88] ss:$16 sps:$4 sm:$0xff]   ;;  %v2263_v34 = vld [vmem:[#allocation2 + $0xac] ss:$16 sps:$4 sm:$0xff]  }
  0x31   :  { %259 = vmatprep.mubr.bf16.mxu1 %v2530_v0  ;;  %1275 = vmatpush1.bf16.msra.mxu1 %v2231_v13  ;;  %v2225_v33 = vld [vmem:[%s2797_s0 + $0x18] sm:$0xff]   ;;  %v2258_v35 = vld [vmem:[#allocation2 + $0xa0] ss:$16 sps:$4 sm:$0xff]   ;;  %v2266_v36 = vld [vmem:[#allocation2 + $0xc4] ss:$16 sps:$4 sm:$0xff]  }
  0x32   :  { %1276 = vmatprep.subr.bf16.mxu1 %v2239_v16  ;;  %v2261_v37 = vld [vmem:[#allocation2 + $0xa8] ss:$16 sps:$4 sm:$0xff]   ;;  %v2269_v38 = vld [vmem:[#allocation2 + $0xcc] ss:$16 sps:$4 sm:$0xff]   ;;  %v2264_v39 = vld [vmem:[#allocation2 + $0xc0] ss:$16 sps:$4 sm:$0xff]  }
  0x33   :  { %1131 = vmatpush1.bf16.msra.mxu0 %v2234_v17  ;;  %v2272_v40 = vld [vmem:[#allocation2 + $0xe4] ss:$16 sps:$4 sm:$0xff]   ;;  %v2267_v41 = vld [vmem:[#allocation2 + $0xc8] ss:$16 sps:$4 sm:$0xff]   ;;  %v2275_v42 = vld [vmem:[#allocation2 + $0xec] ss:$16 sps:$4 sm:$0xff]  }
  0x34   :  { %1132 = vmatprep.subr.bf16.mxu0 %v2242_v18  ;;  %v2270_v43 = vld [vmem:[#allocation2 + $0xe0] ss:$16 sps:$4 sm:$0xff]   ;;  %v2278_v44 = vld [vmem:[#allocation2 + $0x104] ss:$16 sps:$4 sm:$0xff]   ;;  %v2273_v45 = vld [vmem:[#allocation2 + $0xe8] ss:$16 sps:$4 sm:$0xff]  }
  0x35   :  { %1277 = vmatpush1.bf16.msra.mxu1 %v2237_v19  ;;  %v2281_v46 = vld [vmem:[#allocation2 + $0x10c] ss:$16 sps:$4 sm:$0xff]   ;;  %v2276_v47 = vld [vmem:[#allocation2 + $0x100] ss:$16 sps:$4 sm:$0xff]   ;;  %v2284_v48 = vld [vmem:[#allocation2 + $0x124] ss:$16 sps:$4 sm:$0xff]  }
  0x36   :  { %1897 = vmatmul.mubr.msk.bf16.gmra.mrb[4].mxu0 %vm118_vm1, %v2223_v15  ;;  %1278 = vmatprep.subr.bf16.mxu1 %v2245_v20  ;;  %v2279_v49 = vld [vmem:[#allocation2 + $0x108] ss:$16 sps:$4 sm:$0xff]   ;;  %v2282_v50 = vld [vmem:[#allocation2 + $0x120] ss:$16 sps:$4 sm:$0xff]   ;;  %v2287_v51 = vld [vmem:[#allocation2 + $0x12c] ss:$16 sps:$4 sm:$0xff]  }
  0x37   :  { %196 = vmatprep.mubr.bf16.mxu0 %v2530_v0  ;;  %1133 = vmatpush1.bf16.msra.mxu0 %v2240_v21  ;;  %v2285_v52 = vld [vmem:[#allocation2 + $0x128] ss:$16 sps:$4 sm:$0xff]   ;;  %v2290_v53 = vld [vmem:[#allocation2 + $0x144] ss:$16 sps:$4 sm:$0xff]   ;;  %v2293_v54 = vld [vmem:[#allocation2 + $0x14c] ss:$16 sps:$4 sm:$0xff]  }
  0x38   :  { %1902 = vmatmul.mubr.msk.bf16.gmra.mrb[4].mxu1 %vm118_vm1, %v2223_v15  ;;  %1134 = vmatprep.subr.bf16.mxu0 %v2248_v22  ;;  %v2288_v55 = vld [vmem:[#allocation2 + $0x140] ss:$16 sps:$4 sm:$0xff]   ;;  %v2296_v56 = vld [vmem:[#allocation2 + $0x164] ss:$16 sps:$4 sm:$0xff]   ;;  %v2291_v57 = vld [vmem:[#allocation2 + $0x148] ss:$16 sps:$4 sm:$0xff]   ;;  %v68_v15 = vlaneseq }
  0x39   :  { %269 = vmatprep.mubr.bf16.mxu1 %v2530_v0  ;;  %1279 = vmatpush1.bf16.msra.mxu1 %v2243_v23  ;;  %v2299_v58 = vld [vmem:[#allocation2 + $0x16c] ss:$16 sps:$4 sm:$0xff]   ;;  %v2294_v59 = vld [vmem:[#allocation2 + $0x160] ss:$16 sps:$4 sm:$0xff]   ;;  %v2302_v60 = vld [vmem:[#allocation2 + $0x184] ss:$16 sps:$4 sm:$0xff]  }
  0x3a   :  { %1280 = vmatprep.subr.bf16.mxu1 %v2251_v25  ;;  %v2297_v61 = vld [vmem:[#allocation2 + $0x168] ss:$16 sps:$4 sm:$0xff]   ;;  %v2305_v62 = vld [vmem:[#allocation2 + $0x18c] ss:$16 sps:$4 sm:$0xff]   ;;  %v2300_v63 = vld [vmem:[#allocation2 + $0x180] ss:$16 sps:$4 sm:$0xff]  }
  0x3b   :  { %1135 = vmatpush1.bf16.msra.mxu0 %v2246_v26  ;;  %v2303_v1 = vld [vmem:[#allocation2 + $0x188] ss:$16 sps:$4 sm:$0xff]   ;;  %v2311_v2 = vld [vmem:[#allocation2 + $0x1ac] ss:$16 sps:$4 sm:$0xff]   ;;  %v2306_v3 = vld [vmem:[#allocation2 + $0x1a0] ss:$16 sps:$4 sm:$0xff]  }
  0x3c   :  { %1136 = vmatprep.subr.bf16.mxu0 %v2254_v27  ;;  %v2309_v4 = vld [vmem:[#allocation2 + $0x1a8] ss:$16 sps:$4 sm:$0xff]   ;;  %v2314_v5 = vld [vmem:[#allocation2 + $0x1c4] ss:$16 sps:$4 sm:$0xff]   ;;  %v2317_v6 = vld [vmem:[#allocation2 + $0x1cc] ss:$16 sps:$4 sm:$0xff]  }
  0x3d   :  { %1281 = vmatpush1.bf16.msra.mxu1 %v2249_v28  ;;  %v2312_v7 = vld [vmem:[#allocation2 + $0x1c0] ss:$16 sps:$4 sm:$0xff]   ;;  %v2315_v8 = vld [vmem:[#allocation2 + $0x1c8] ss:$16 sps:$4 sm:$0xff]   ;;  %v2320_v9 = vld [vmem:[#allocation2 + $0x1e4] ss:$16 sps:$4 sm:$0xff]  }
  0x3e   :  { %1898 = vmatmul.mubr.msk.bf16.gmra.mrb[8].mxu0 %vm118_vm1, %v2224_v24  ;;  %1282 = vmatprep.subr.bf16.mxu1 %v2257_v29  ;;  %v2323_v10 = vld [vmem:[#allocation2 + $0x1ec] ss:$16 sps:$4 sm:$0xff]   ;;  %v2318_v11 = vld [vmem:[#allocation2 + $0x1e0] ss:$16 sps:$4 sm:$0xff]   ;;  %v2321_v12 = vld [vmem:[#allocation2 + $0x1e8] ss:$16 sps:$4 sm:$0xff]  }
  0x3f   :  { %206 = vmatprep.mubr.bf16.mxu0 %v2530_v0  ;;  %1137 = vmatpush1.bf16.msra.mxu0 %v2252_v30  ;;  %v2326_v13 = vld [vmem:[#allocation2 + $0x204] ss:$16 sps:$4 sm:$0xff]   ;;  %v2329_v14 = vld [vmem:[#allocation2 + $0x20c] ss:$16 sps:$4 sm:$0xff]   ;;  %v2632_v16 = vshrl.u32 %v68_v15, 7 }
  0x40   :  { %1903 = vmatmul.mubr.msk.bf16.gmra.mrb[8].mxu1 %vm118_vm1, %v2224_v24  ;;  %1138 = vmatprep.subr.bf16.mxu0 %v2260_v31  ;;  %v66_v18 = vld [vmem:[%s2799_s2] sm:$0xf] }
  0x41   :  { %279 = vmatprep.mubr.bf16.mxu1 %v2530_v0  ;;  %1283 = vmatpush1.bf16.msra.mxu1 %v2255_v32  ;;  %v2308_v0 = vld [vmem:[#allocation2 + $0x1a4] ss:$16 sps:$4 sm:$0xff]   ;;  %v70_v17 = vsub.s32 0, %v2632_v16  ;;  %v74_v19 = vsub.s32 1, %v2632_v16  ;;  %v78_v21 = vsub.s32 2, %v2632_v16  ;;  %v82_v23 = vsub.s32 3, %v2632_v16 }
  0x42   :  { %1284 = vmatprep.subr.bf16.mxu1 %v2263_v34 }
  0x43   :  { %1139 = vmatpush1.bf16.msra.mxu0 %v2258_v35  ;;  %v2641_v20 = vrot.slane %v66_v18, %v70_v17  ;;  %v2646_v22 = vrot.slane %v66_v18, %v74_v19  ;;  %v2652_v27 = vrot.slane %v66_v18, %v78_v21  ;;  %v2657_v30 = vrot.slane %v66_v18, %v82_v23 }
  0x44   :  { %1140 = vmatprep.subr.bf16.mxu0 %v2266_v36 }
  0x45   :  { %1285 = vmatpush1.bf16.msra.mxu1 %v2261_v37 }
  0x46   :  { %1899 = vmatmul.mubr.msk.bf16.gmra.mrb[12].mxu0 %vm118_vm1, %v2225_v33  ;;  %1286 = vmatprep.subr.bf16.mxu1 %v2269_v38 }
  0x47   :  { %1141 = vmatpush1.bf16.msra.mxu0 %v2264_v39 }
  0x48   :  { %1904 = vmatmul.mubr.msk.bf16.gmra.mrb[12].mxu1 %vm118_vm1, %v2225_v33  ;;  %1142 = vmatprep.subr.bf16.mxu0 %v2272_v40 }
  0x49   :  { %1287 = vmatpush1.bf16.msra.mxu1 %v2267_v41 }
  0x4a   :  { %1288 = vmatprep.subr.bf16.mxu1 %v2275_v42 }
  0x4b   :  { %1143 = vmatpush1.bf16.msra.mxu0 %v2270_v43 }
  0x4c   :  { %1144 = vmatprep.subr.bf16.mxu0 %v2278_v44 }
  0x4d   :  { %1289 = vmatpush1.bf16.msra.mxu1 %v2273_v45 }
  0x4e   :  { %1290 = vmatprep.subr.bf16.mxu1 %v2281_v46 }
  0x4f   :  { %1145 = vmatpush1.bf16.msra.mxu0 %v2276_v47 }
  0x50   :  { %1146 = vmatprep.subr.bf16.mxu0 %v2284_v48  ;;  %v2324_v48 = vld [vmem:[#allocation2 + $0x200] ss:$16 sps:$4 sm:$0xff]  }
  0x51   :  { %1291 = vmatpush1.bf16.msra.mxu1 %v2279_v49  ;;  %v2327_v49 = vld [vmem:[#allocation2 + $0x208] ss:$16 sps:$4 sm:$0xff]  }
  0x52   :  { %1292 = vmatprep.subr.bf16.mxu1 %v2287_v51 }
  0x53   :  { %1147 = vmatpush1.bf16.msra.mxu0 %v2282_v50 }
  0x54   :  { %1148 = vmatprep.subr.bf16.mxu0 %v2290_v53  ;;  %v2332_v53 = vld [vmem:[#allocation2 + $0x224] ss:$16 sps:$4 sm:$0xff]  }
  0x55   :  { %1293 = vmatpush1.bf16.msra.mxu1 %v2285_v52 }
  0x56   :  { %1294 = vmatprep.subr.bf16.mxu1 %v2293_v54  ;;  %v2335_v54 = vld [vmem:[#allocation2 + $0x22c] ss:$16 sps:$4 sm:$0xff]  }
  0x57   :  { %1149 = vmatpush1.bf16.msra.mxu0 %v2288_v55 }
  0x58   :  { %1150 = vmatprep.subr.bf16.mxu0 %v2296_v56 }
  0x59   :  { %1295 = vmatpush1.bf16.msra.mxu1 %v2291_v57 }
  0x5a   :  { %1296 = vmatprep.subr.bf16.mxu1 %v2299_v58 }
  0x5b   :  { %1151 = vmatpush1.bf16.msra.mxu0 %v2294_v59 }
  0x5c   :  { %1152 = vmatprep.subr.bf16.mxu0 %v2302_v60 }
  0x5d   :  { %1297 = vmatpush1.bf16.msra.mxu1 %v2297_v61 }
  0x5e   :  { %1298 = vmatprep.subr.bf16.mxu1 %v2305_v62 }
  0x5f   :  { %1153 = vmatpush1.bf16.msra.mxu0 %v2300_v63 }
  0x60   :  { %1154 = vmatprep.subr.bf16.mxu0 %v2308_v0 }
  0x61   :  { %1299 = vmatpush1.bf16.msra.mxu1 %v2303_v1  ;;  %v2330_v1 = vld [vmem:[#allocation2 + $0x220] ss:$16 sps:$4 sm:$0xff]  }
  0x62   :  { %1300 = vmatprep.subr.bf16.mxu1 %v2311_v2  ;;  %v2333_v2 = vld [vmem:[#allocation2 + $0x228] ss:$16 sps:$4 sm:$0xff]  }
  0x63   :  { %1155 = vmatpush1.bf16.msra.mxu0 %v2306_v3 }
  0x64   :  { %1156 = vmatprep.subr.bf16.mxu0 %v2314_v5 }
  0x65   :  { %1301 = vmatpush1.bf16.msra.mxu1 %v2309_v4 }
  0x66   :  { %1302 = vmatprep.subr.bf16.mxu1 %v2317_v6 }
  0x67   :  { %1157 = vmatpush1.bf16.msra.mxu0 %v2312_v7  ;;  %v2338_v7 = vld [vmem:[#allocation2 + $0x244] ss:$16 sps:$4 sm:$0xff]  }
  0x68   :  { %1158 = vmatprep.subr.bf16.mxu0 %v2320_v9 }
  0x69   :  { %1303 = vmatpush1.bf16.msra.mxu1 %v2315_v8  ;;  %v2341_v8 = vld [vmem:[#allocation2 + $0x24c] ss:$16 sps:$4 sm:$0xff]  }
  0x6a   :  { %1304 = vmatprep.subr.bf16.mxu1 %v2323_v10 }
  0x6b   :  { %1159 = vmatpush1.bf16.msra.mxu0 %v2318_v11 }
  0x6c   :  { %1201 = vmatprep.subr.bf16.mxu0 %v2326_v13 }
  0x6d   :  { %1305 = vmatpush1.bf16.msra.mxu1 %v2321_v12 }
  0x6e   :  { %1347 = vmatprep.subr.bf16.mxu1 %v2329_v14 }
 0x101   :  { %v178_v24 = vpop.f32.mrb[0].mxu0 }
 0x102   :  { %v179_v25 = vadd.f32 %v178_v24, %v2641_v20  ;;  %v180_v26 = vpop.f32.mrb[1].mxu0 }
 0x103   :  { %v181_v28 = vadd.f32 %v180_v26, %v2646_v22  ;;  %v182_v29 = vpop.f32.mrb[2].mxu0  ;;  %v251_v34 = vpop.f32.mrb[0].mxu1  ;;  %v2336_v26 = vld [vmem:[#allocation2 + $0x240] ss:$16 sps:$4 sm:$0xff]  }
 0x104   :  { %v183_v31 = vadd.f32 %v182_v29, %v2641_v20  ;;  %v184_v32 = vpop.f32.mrb[3].mxu0  ;;  %v290_v35 = vmax.f32 %v179_v25, 0.0  ;;  %v252_v37 = vadd.f32 %v251_v34, %v2652_v27  ;;  %v253_v38 = vpop.f32.mrb[1].mxu1  ;;  %v2344_v34 = vld [vmem:[#allocation2 + $0x264] ss:$16 sps:$4 sm:$0xff]  }
 0x105   :  { %v185_v33 = vadd.f32 %v184_v32, %v2646_v22  ;;  %v291_v39 = vmax.f32 %v181_v28, 0.0  ;;  %v254_v41 = vadd.f32 %v253_v38, %v2657_v30  ;;  %v255_v42 = vpop.f32.mrb[2].mxu1  ;;  %v2339_v28 = vld [vmem:[#allocation2 + $0x248] ss:$16 sps:$4 sm:$0xff]  }
 0x106   :  { %v294_v36 = vmax.f32 %v183_v31, 0.0  ;;  %v292_v44 = vmax.f32 %v252_v37, 0.0  ;;  %v256_v45 = vadd.f32 %v255_v42, %v2652_v27  ;;  %v257_v46 = vpop.f32.mrb[3].mxu1 }
 0x107   :  { %v295_v40 = vmax.f32 %v185_v33, 0.0  ;;  %v293_v51 = vmax.f32 %v254_v41, 0.0  ;;  %v258_v52 = vadd.f32 %v257_v46, %v2657_v30  ;;  %v2342_v46 = vld [vmem:[#allocation2 + $0x260] ss:$16 sps:$4 sm:$0xff]  }
 0x108   :  { %v322_v43 = vpack.c.bf16 %v294_v36, %v290_v35  ;;  %v296_v57 = vmax.f32 %v256_v45, 0.0  ;;  %v2347_v35 = vld [vmem:[#allocation2 + $0x26c] ss:$16 sps:$4 sm:$0xff]  }
 0x109   :  { %v323_v47 = vpack.c.bf16 %v295_v40, %v291_v39  ;;  %v188_v50 = vpop.f32.mrb[4].mxu0  ;;  %v297_v60 = vmax.f32 %v258_v52, 0.0  ;;  %v2350_v52 = vld [vmem:[#allocation2 + $0x284] ss:$16 sps:$4 sm:$0xff]  }
 0x10a   :  { %v189_v55 = vadd.f32 %v188_v50, %v2641_v20  ;;  %v190_v56 = vpop.f32.mrb[5].mxu0  ;;  %v2668_v0 = vpack.c.bf16 %v296_v57, %v292_v44 }
 0x10b   :  { %1160 = vmatprep.mubr.bf16.mxu0 %v323_v47  ;;  %1306 = vmatprep.mubr.bf16.mxu1 %v323_v47  ;;  %v191_v58 = vadd.f32 %v190_v56, %v2646_v22  ;;  %v192_v59 = vpop.f32.mrb[6].mxu0  ;;  %v2671_v5 = vpack.c.bf16 %v297_v60, %v293_v51  ;;  %v261_v6 = vpop.f32.mrb[4].mxu1  ;;  %v2345_v47 = vld [vmem:[#allocation2 + $0x268] ss:$16 sps:$4 sm:$0xff]  }
 0x10c   :  { %1161 = vmatmul.mubr.bf16.vlgmr.msra.gmra.mrb[16].mxu0 %v322_v43  ;;  %1307 = vmatmul.mubr.bf16.vlgmr.msra.gmra.mrb[16].mxu1 %v322_v43  ;;  %v298_v61 = vmax.f32 %v189_v55, 0.0  ;;  %v193_v62 = vadd.f32 %v192_v59, %v2641_v20  ;;  %v194_v63 = vpop.f32.mrb[7].mxu0  ;;  %v262_v10 = vadd.f32 %v261_v6, %v2652_v27  ;;  %v263_v11 = vpop.f32.mrb[5].mxu1 }
 0x10d   :  { %1202 = vmatpush1.bf16.msra.mxu0 %v2324_v48  ;;  %1348 = vmatpush1.bf16.msra.mxu1 %v2327_v49  ;;  %v299_v3 = vmax.f32 %v191_v58, 0.0  ;;  %v195_v4 = vadd.f32 %v194_v63, %v2646_v22  ;;  %v264_v13 = vadd.f32 %v263_v11, %v2657_v30  ;;  %v265_v14 = vpop.f32.mrb[6].mxu1 }
 0x10e   :  { %1203 = vmatprep.subr.bf16.mxu0 %v2332_v53  ;;  %1349 = vmatprep.subr.bf16.mxu1 %v2335_v54  ;;  %v302_v9 = vmax.f32 %v193_v62, 0.0  ;;  %v300_v18 = vmax.f32 %v262_v10, 0.0  ;;  %v266_v24 = vadd.f32 %v265_v14, %v2652_v27  ;;  %v267_v25 = vpop.f32.mrb[7].mxu1  ;;  %v2353_v53 = vld [vmem:[#allocation2 + $0x28c] ss:$16 sps:$4 sm:$0xff]  }
 0x10f   :  { %v303_v12 = vmax.f32 %v195_v4, 0.0  ;;  %v301_v32 = vmax.f32 %v264_v13, 0.0  ;;  %v268_v33 = vadd.f32 %v267_v25, %v2657_v30 }
 0x110   :  { %v326_v15 = vpack.c.bf16 %v302_v9, %v298_v61  ;;  %v304_v38 = vmax.f32 %v266_v24, 0.0  ;;  %v2359_v9 = vld [vmem:[#allocation2 + $0x2ac] ss:$16 sps:$4 sm:$0xff]  }
 0x111   :  { %1204 = vmatpush1.bf16.msra.mxu0 %v2330_v1  ;;  %1350 = vmatpush1.bf16.msra.mxu1 %v2333_v2  ;;  %v327_v29 = vpack.c.bf16 %v303_v12, %v299_v3  ;;  %v198_v31 = vpop.f32.mrb[8].mxu0  ;;  %v305_v41 = vmax.f32 %v268_v33, 0.0  ;;  %v2348_v1 = vld [vmem:[#allocation2 + $0x280] ss:$16 sps:$4 sm:$0xff]   ;;  %v2351_v2 = vld [vmem:[#allocation2 + $0x288] ss:$16 sps:$4 sm:$0xff]  }
 0x112   :  { %1205 = vmatprep.subr.bf16.mxu0 %v2338_v7  ;;  %1351 = vmatprep.subr.bf16.mxu1 %v2341_v8  ;;  %v199_v36 = vadd.f32 %v198_v31, %v2641_v20  ;;  %v200_v37 = vpop.f32.mrb[9].mxu0  ;;  %v2680_v45 = vpack.c.bf16 %v304_v38, %v300_v18  ;;  %v2356_v8 = vld [vmem:[#allocation2 + $0x2a4] ss:$16 sps:$4 sm:$0xff]  }
 0x113   :  { %v201_v39 = vadd.f32 %v200_v37, %v2646_v22  ;;  %v202_v40 = vpop.f32.mrb[10].mxu0  ;;  %1170 = vmatprep.mubr.bf16.mxu0 %v327_v29  ;;  %1316 = vmatprep.mubr.bf16.mxu1 %v327_v29  ;;  %v2683_v50 = vpack.c.bf16 %v305_v41, %v301_v32  ;;  %v271_v51 = vpop.f32.mrb[8].mxu1  ;;  %v2357_v29 = vld [vmem:[#allocation2 + $0x2a8] ss:$16 sps:$4 sm:$0xff]  }
 0x114   :  { %v306_v42 = vmax.f32 %v199_v36, 0.0  ;;  %v203_v43 = vadd.f32 %v202_v40, %v2641_v20  ;;  %v204_v44 = vpop.f32.mrb[11].mxu0  ;;  %1171 = vmatmul.mubr.bf16.gmra.mrb[20].mxu0 %v326_v15  ;;  %1317 = vmatmul.mubr.bf16.gmra.mrb[20].mxu1 %v326_v15  ;;  %v272_v55 = vadd.f32 %v271_v51, %v2652_v27  ;;  %v273_v56 = vpop.f32.mrb[9].mxu1  ;;  %v2365_v36 = vld [vmem:[#allocation2 + $0x2cc] ss:$16 sps:$4 sm:$0xff]  }
 0x115   :  { %1206 = vmatpush1.bf16.msra.mxu0 %v2336_v26  ;;  %1352 = vmatpush1.bf16.msra.mxu1 %v2339_v28  ;;  %v307_v48 = vmax.f32 %v201_v39, 0.0  ;;  %v205_v49 = vadd.f32 %v204_v44, %v2646_v22  ;;  %v274_v58 = vadd.f32 %v273_v56, %v2657_v30  ;;  %v275_v59 = vpop.f32.mrb[10].mxu1  ;;  %v2354_v28 = vld [vmem:[#allocation2 + $0x2a0] ss:$16 sps:$4 sm:$0xff]  }
 0x116   :  { %1207 = vmatprep.subr.bf16.mxu0 %v2344_v34  ;;  %1353 = vmatprep.subr.bf16.mxu1 %v2347_v35  ;;  %v310_v54 = vmax.f32 %v203_v43, 0.0  ;;  %v308_v61 = vmax.f32 %v272_v55, 0.0  ;;  %v276_v62 = vadd.f32 %v275_v59, %v2652_v27  ;;  %v277_v63 = vpop.f32.mrb[11].mxu1  ;;  %v2362_v35 = vld [vmem:[#allocation2 + $0x2c4] ss:$16 sps:$4 sm:$0xff]  }
 0x117   :  { %v311_v57 = vmax.f32 %v205_v49, 0.0  ;;  %v309_v6 = vmax.f32 %v274_v58, 0.0  ;;  %v278_v7 = vadd.f32 %v277_v63, %v2657_v30  ;;  %v2366_v56 = vld [vmem:[#allocation2 + $0x2e0] ss:$16 sps:$4 sm:$0xff]   ;;  %v2377_v59 = vld [vmem:[#allocation2 + $0x30c] ss:$16 sps:$4 sm:$0xff]  }
 0x118   :  { %v330_v60 = vpack.c.bf16 %v310_v54, %v306_v42  ;;  %v312_v12 = vmax.f32 %v276_v62, 0.0  ;;  %v2380_v62 = vld [vmem:[#allocation2 + $0x324] ss:$16 sps:$4 sm:$0xff]   ;;  %v2383_v63 = vld [vmem:[#allocation2 + $0x32c] ss:$16 sps:$4 sm:$0xff]  }
 0x119   :  { %1208 = vmatpush1.bf16.msra.mxu0 %v2342_v46  ;;  %1354 = vmatpush1.bf16.msra.mxu1 %v2345_v47  ;;  %v331_v3 = vpack.c.bf16 %v311_v57, %v307_v48  ;;  %v208_v4 = vpop.f32.mrb[12].mxu0  ;;  %v313_v15 = vmax.f32 %v278_v7, 0.0  ;;  %v2360_v46 = vld [vmem:[#allocation2 + $0x2c0] ss:$16 sps:$4 sm:$0xff]   ;;  %v2363_v47 = vld [vmem:[#allocation2 + $0x2c8] ss:$16 sps:$4 sm:$0xff]  }
 0x11a   :  { %1209 = vmatprep.subr.bf16.mxu0 %v2350_v52  ;;  %1355 = vmatprep.subr.bf16.mxu1 %v2353_v53  ;;  %v209_v10 = vadd.f32 %v208_v4, %v2641_v20  ;;  %v210_v11 = vpop.f32.mrb[13].mxu0  ;;  %v2692_v26 = vpack.c.bf16 %v312_v12, %v308_v61  ;;  %v2368_v52 = vld [vmem:[#allocation2 + $0x2e4] ss:$16 sps:$4 sm:$0xff]   ;;  %v2371_v53 = vld [vmem:[#allocation2 + $0x2ec] ss:$16 sps:$4 sm:$0xff]  }
 0x11b   :  { %v211_v13 = vadd.f32 %v210_v11, %v2646_v22  ;;  %v212_v14 = vpop.f32.mrb[14].mxu0  ;;  %1180 = vmatprep.mubr.bf16.mxu0 %v331_v3  ;;  %1326 = vmatprep.mubr.bf16.mxu1 %v331_v3  ;;  %v2695_v33 = vpack.c.bf16 %v313_v15, %v309_v6  ;;  %v281_v34 = vpop.f32.mrb[12].mxu1  ;;  %v2369_v57 = vld [vmem:[#allocation2 + $0x2e8] ss:$16 sps:$4 sm:$0xff]   ;;  %v2386_v3 = vld [vmem:[#allocation2 + $0x344] ss:$16 sps:$4 sm:$0xff]  }
 0x11c   :  { %v314_v18 = vmax.f32 %v209_v10, 0.0  ;;  %v213_v24 = vadd.f32 %v212_v14, %v2641_v20  ;;  %v214_v25 = vpop.f32.mrb[15].mxu0  ;;  %1181 = vmatmul.mubr.bf16.gmra.mrb[24].mxu0 %v330_v60  ;;  %1327 = vmatmul.mubr.bf16.gmra.mrb[24].mxu1 %v330_v60  ;;  %v282_v37 = vadd.f32 %v281_v34, %v2652_v27  ;;  %v283_v38 = vpop.f32.mrb[13].mxu1  ;;  %v2372_v60 = vld [vmem:[#allocation2 + $0x300] ss:$16 sps:$4 sm:$0xff]  }
 0x11d   :  { %1210 = vmatpush1.bf16.msra.mxu0 %v2348_v1  ;;  %1356 = vmatpush1.bf16.msra.mxu1 %v2351_v2  ;;  %v315_v31 = vmax.f32 %v211_v13, 0.0  ;;  %v215_v32 = vadd.f32 %v214_v25, %v2646_v22  ;;  %v284_v40 = vadd.f32 %v283_v38, %v2657_v30  ;;  %v285_v41 = vpop.f32.mrb[14].mxu1  ;;  %v2375_v61 = vld [vmem:[#allocation2 + $0x308] ss:$16 sps:$4 sm:$0xff]   ;;  %v2378_v1 = vld [vmem:[#allocation2 + $0x320] ss:$16 sps:$4 sm:$0xff]  }
 0x11e   :  { %1211 = vmatprep.subr.bf16.mxu0 %v2356_v8  ;;  %1357 = vmatprep.subr.bf16.mxu1 %v2359_v9  ;;  %v318_v20 = vmax.f32 %v213_v24, 0.0  ;;  %v316_v43 = vmax.f32 %v282_v37, 0.0  ;;  %v286_v44 = vadd.f32 %v285_v41, %v2652_v27  ;;  %v287_v22 = vpop.f32.mrb[15].mxu1  ;;  %v2381_v2 = vld [vmem:[#allocation2 + $0x328] ss:$16 sps:$4 sm:$0xff]   ;;  %v2420_v37 = vld [vmem:[#allocation5 + $0x40] sm:$0xff]  }
 0x11f   :  { %v319_v39 = vmax.f32 %v215_v32, 0.0  ;;  %v317_v49 = vmax.f32 %v284_v40, 0.0  ;;  %v288_v51 = vadd.f32 %v287_v22, %v2657_v30  ;;  %v2374_v30 = vld [vmem:[#allocation2 + $0x304] ss:$16 sps:$4 sm:$0xff]   ;;  %v2389_v4 = vld [vmem:[#allocation2 + $0x34c] ss:$16 sps:$4 sm:$0xff]  }
 0x120   :  { %v334_v42 = vpack.c.bf16 %v318_v20, %v314_v18  ;;  %v320_v54 = vmax.f32 %v286_v44, 0.0  ;;  %v2384_v6 = vld [vmem:[#allocation2 + $0x340] ss:$16 sps:$4 sm:$0xff]   ;;  %v2392_v7 = vld [vmem:[#allocation2 + $0x364] ss:$16 sps:$4 sm:$0xff]   ;;  %v2424_v41 = vld [vmem:[#allocation5 + $0x48] sm:$0xff]  }
 0x121   :  { %1212 = vmatpush1.bf16.msra.mxu0 %v2354_v28  ;;  %1358 = vmatpush1.bf16.msra.mxu1 %v2357_v29  ;;  %v335_v48 = vpack.c.bf16 %v319_v39, %v315_v31  ;;  %v321_v55 = vmax.f32 %v288_v51, 0.0  ;;  %v2395_v8 = vld [vmem:[#allocation2 + $0x36c] ss:$16 sps:$4 sm:$0xff]   ;;  %v2390_v9 = vld [vmem:[#allocation2 + $0x360] ss:$16 sps:$4 sm:$0xff]  }
 0x122   :  { %1213 = vmatprep.subr.bf16.mxu0 %v2362_v35  ;;  %1359 = vmatprep.subr.bf16.mxu1 %v2365_v36  ;;  %v2701_v27 = vpack.c.bf16 %v320_v54, %v316_v43  ;;  %v2393_v10 = vld [vmem:[#allocation2 + $0x368] ss:$16 sps:$4 sm:$0xff]   ;;  %v2398_v11 = vld [vmem:[#allocation2 + $0x384] ss:$16 sps:$4 sm:$0xff]   ;;  %v2401_v12 = vld [vmem:[#allocation2 + $0x38c] ss:$16 sps:$4 sm:$0xff]  }
 0x123   :  { %1190 = vmatprep.mubr.bf16.mxu0 %v335_v48  ;;  %1336 = vmatprep.mubr.bf16.mxu1 %v335_v48  ;;  %v2703_v58 = vpack.c.bf16 %v321_v55, %v317_v49  ;;  %v2396_v13 = vld [vmem:[#allocation2 + $0x380] ss:$16 sps:$4 sm:$0xff]   ;;  %v2399_v14 = vld [vmem:[#allocation2 + $0x388] ss:$16 sps:$4 sm:$0xff]   ;;  %v2404_v15 = vld [vmem:[#allocation2 + $0x3a4] ss:$16 sps:$4 sm:$0xff]  }
 0x124   :  { %1191 = vmatmul.mubr.bf16.gmra.mrb[28].mxu0 %v334_v42  ;;  %1337 = vmatmul.mubr.bf16.gmra.mrb[28].mxu1 %v334_v42  ;;  %v2407_v18 = vld [vmem:[#allocation2 + $0x3ac] ss:$16 sps:$4 sm:$0xff]   ;;  %v2402_v24 = vld [vmem:[#allocation2 + $0x3a0] ss:$16 sps:$4 sm:$0xff]   ;;  %v2405_v25 = vld [vmem:[#allocation2 + $0x3a8] ss:$16 sps:$4 sm:$0xff]  }
 0x125   :  { %1214 = vmatpush1.bf16.msra.mxu0 %v2360_v46  ;;  %1360 = vmatpush1.bf16.msra.mxu1 %v2363_v47  ;;  %v2410_v28 = vld [vmem:[#allocation2 + $0x3c4] ss:$16 sps:$4 sm:$0xff]   ;;  %v2413_v29 = vld [vmem:[#allocation2 + $0x3cc] ss:$16 sps:$4 sm:$0xff]   ;;  %v2408_v31 = vld [vmem:[#allocation2 + $0x3c0] ss:$16 sps:$4 sm:$0xff]  }
 0x126   :  { %1215 = vmatprep.subr.bf16.mxu0 %v2368_v52  ;;  %1361 = vmatprep.subr.bf16.mxu1 %v2371_v53  ;;  %v2411_v32 = vld [vmem:[#allocation2 + $0x3c8] ss:$16 sps:$4 sm:$0xff]   ;;  %v2416_v34 = vld [vmem:[#allocation2 + $0x3e4] ss:$16 sps:$4 sm:$0xff]   ;;  %v2419_v35 = vld [vmem:[#allocation2 + $0x3ec] ss:$16 sps:$4 sm:$0xff]  }
 0x127   :  { %1233 = vmatprep.mubr.bf16.mxu0 %v2671_v5  ;;  %1379 = vmatprep.mubr.bf16.mxu1 %v2671_v5  ;;  %v2387_v5 = vld [vmem:[#allocation2 + $0x348] ss:$16 sps:$4 sm:$0xff]   ;;  %v2414_v36 = vld [vmem:[#allocation2 + $0x3e0] ss:$16 sps:$4 sm:$0xff]  }
 0x128   :  { %v2417_v20 = vld [vmem:[#allocation2 + $0x3e8] ss:$16 sps:$4 sm:$0xff]   ;;  %v2422_v38 = vld [vmem:[#allocation5 + $0xc0] sm:$0xff]   ;;  %v2428_v22 = vld [vmem:[#allocation5 + $0x50] sm:$0xff]  }
 0x129   :  { %1216 = vmatpush1.bf16.msra.mxu0 %v2366_v56  ;;  %1362 = vmatpush1.bf16.msra.mxu1 %v2369_v57  ;;  %v2421_v39 = vld [vmem:[#allocation5] sm:$0xff]   ;;  %v2426_v42 = vld [vmem:[#allocation5 + $0xc8] sm:$0xff]   ;;  %v2430_v46 = vld [vmem:[#allocation5 + $0xd0] sm:$0xff]  }
 0x12a   :  { %1217 = vmatprep.subr.bf16.mxu0 %v2374_v30  ;;  %1363 = vmatprep.subr.bf16.mxu1 %v2377_v59  ;;  %v2423_v40 = vld [vmem:[#allocation5 + $0x80] sm:$0xff]   ;;  %v2425_v43 = vld [vmem:[#allocation5 + $0x8] sm:$0xff]   ;;  %v2429_v47 = vld [vmem:[#allocation5 + $0x10] sm:$0xff]  }
 0x12b   :  { %v2427_v44 = vld [vmem:[#allocation5 + $0x88] sm:$0xff]   ;;  %v2431_v48 = vld [vmem:[#allocation5 + $0x90] sm:$0xff]   ;;  %v2432_v49 = vld [vmem:[#allocation5 + $0x58] sm:$0xff]  }
 0x12c   :  { %v2435_v51 = vld [vmem:[#allocation5 + $0x98] sm:$0xff]   ;;  %v2436_v52 = vld [vmem:[#allocation5 + $0x60] sm:$0xff]   ;;  %v2440_v56 = vld [vmem:[#allocation5 + $0x68] sm:$0xff]  }
 0x12d   :  { %1218 = vmatpush1.bf16.msra.mxu0 %v2372_v60  ;;  %1364 = vmatpush1.bf16.msra.mxu1 %v2375_v61  ;;  %v2438_v53 = vld [vmem:[#allocation5 + $0xe0] sm:$0xff]   ;;  %v2443_v57 = vld [vmem:[#allocation5 + $0xa8] sm:$0xff]   ;;  %v2444_v30 = vld [vmem:[#allocation5 + $0x70] sm:$0xff]  }
 0x12e   :  { %1219 = vmatprep.subr.bf16.mxu0 %v2380_v62  ;;  %1365 = vmatprep.subr.bf16.mxu1 %v2383_v63  ;;  %v2437_v54 = vld [vmem:[#allocation5 + $0x20] sm:$0xff]   ;;  %v2446_v59 = vld [vmem:[#allocation5 + $0xf0] sm:$0xff]   ;;  %v2450_v61 = vld [vmem:[#allocation5 + $0xf8] sm:$0xff]  }
 0x12f   :  { %v2439_v55 = vld [vmem:[#allocation5 + $0xa0] sm:$0xff]   ;;  %v2445_v60 = vld [vmem:[#allocation5 + $0x30] sm:$0xff]   ;;  %v2449_v62 = vld [vmem:[#allocation5 + $0x38] sm:$0xff]  }
 0x130   :  { %v2451_v63 = vld [vmem:[#allocation5 + $0xb8] sm:$0xff]  }
 0x131   :  { %1220 = vmatpush1.bf16.msra.mxu0 %v2378_v1  ;;  %1366 = vmatpush1.bf16.msra.mxu1 %v2381_v2 }
 0x132   :  { %1221 = vmatprep.subr.bf16.mxu0 %v2386_v3  ;;  %1367 = vmatprep.subr.bf16.mxu1 %v2389_v4 }
 0x135   :  { %1222 = vmatpush1.bf16.msra.mxu0 %v2384_v6  ;;  %1368 = vmatpush1.bf16.msra.mxu1 %v2387_v5 }
 0x136   :  { %1223 = vmatprep.subr.bf16.mxu0 %v2392_v7  ;;  %1369 = vmatprep.subr.bf16.mxu1 %v2395_v8 }
 0x139   :  { %1224 = vmatpush1.bf16.msra.mxu0 %v2390_v9  ;;  %1370 = vmatpush1.bf16.msra.mxu1 %v2393_v10 }
 0x13a   :  { %1225 = vmatprep.subr.bf16.mxu0 %v2398_v11  ;;  %1371 = vmatprep.subr.bf16.mxu1 %v2401_v12 }
 0x13d   :  { %1226 = vmatpush1.bf16.msra.mxu0 %v2396_v13  ;;  %1372 = vmatpush1.bf16.msra.mxu1 %v2399_v14 }
 0x13e   :  { %1227 = vmatprep.subr.bf16.mxu0 %v2404_v15  ;;  %1373 = vmatprep.subr.bf16.mxu1 %v2407_v18 }
 0x141   :  { %1228 = vmatpush1.bf16.msra.mxu0 %v2402_v24  ;;  %1374 = vmatpush1.bf16.msra.mxu1 %v2405_v25 }
 0x142   :  { %1229 = vmatprep.subr.bf16.mxu0 %v2410_v28  ;;  %1375 = vmatprep.subr.bf16.mxu1 %v2413_v29 }
 0x145   :  { %1230 = vmatpush1.bf16.msra.mxu0 %v2408_v31  ;;  %1376 = vmatpush1.bf16.msra.mxu1 %v2411_v32 }
 0x146   :  { %1231 = vmatprep.subr.bf16.mxu0 %v2416_v34  ;;  %1377 = vmatprep.subr.bf16.mxu1 %v2419_v35 }
 0x149   :  { %1232 = vmatpush1.bf16.msra.mxu0 %v2414_v36  ;;  %1378 = vmatpush1.bf16.msra.mxu1 %v2417_v20 }
 0x14a   :  { %2066 = vmatprep.subr.bf16.mxu0 %v2420_v37  ;;  %2106 = vmatprep.subr.bf16.mxu1 %v2422_v38 }
 0x14c   :  { %1234 = vmatmul.mubr.bf16.vlgmr.msra.gmra.mrb[16].mxu0 %v2668_v0  ;;  %1380 = vmatmul.mubr.bf16.vlgmr.msra.gmra.mrb[16].mxu1 %v2668_v0  ;;  %v2434_v0 = vld [vmem:[#allocation5 + $0xd8] sm:$0xff]  }
 0x14d   :  { %1243 = vmatprep.mubr.bf16.mxu0 %v2683_v50  ;;  %1389 = vmatprep.mubr.bf16.mxu1 %v2683_v50  ;;  %v2433_v50 = vld [vmem:[#allocation5 + $0x18] sm:$0xff]  }
 0x14e   :  { %2067 = vmatpush3.bf16.msra.mxu0 %v2421_v39  ;;  %2107 = vmatpush3.bf16.msra.mxu1 %v2423_v40 }
 0x14f   :  { %2068 = vmatprep.subr.bf16.mxu0 %v2424_v41  ;;  %2108 = vmatprep.subr.bf16.mxu1 %v2426_v42 }
 0x152   :  { %2069 = vmatpush3.bf16.msra.mxu0 %v2425_v43  ;;  %2109 = vmatpush3.bf16.msra.mxu1 %v2427_v44 }
 0x153   :  { %2070 = vmatprep.subr.bf16.mxu0 %v2428_v22  ;;  %2110 = vmatprep.subr.bf16.mxu1 %v2430_v46 }
 0x154   :  { %1244 = vmatmul.mubr.bf16.gmra.mrb[20].mxu0 %v2680_v45  ;;  %1390 = vmatmul.mubr.bf16.gmra.mrb[20].mxu1 %v2680_v45  ;;  %v2442_v45 = vld [vmem:[#allocation5 + $0xe8] sm:$0xff]  }
 0x155   :  { %1253 = vmatprep.mubr.bf16.mxu0 %v2695_v33  ;;  %1399 = vmatprep.mubr.bf16.mxu1 %v2695_v33  ;;  %v2441_v33 = vld [vmem:[#allocation5 + $0x28] sm:$0xff]  }
 0x156   :  { %2071 = vmatpush3.bf16.msra.mxu0 %v2429_v47  ;;  %2111 = vmatpush3.bf16.msra.mxu1 %v2431_v48 }
 0x157   :  { %2072 = vmatprep.subr.bf16.mxu0 %v2432_v49  ;;  %2112 = vmatprep.subr.bf16.mxu1 %v2434_v0 }
 0x15a   :  { %2073 = vmatpush3.bf16.msra.mxu0 %v2433_v50  ;;  %2113 = vmatpush3.bf16.msra.mxu1 %v2435_v51 }
 0x15b   :  { %2074 = vmatprep.subr.bf16.mxu0 %v2436_v52  ;;  %2114 = vmatprep.subr.bf16.mxu1 %v2438_v53 }
 0x15c   :  { %1254 = vmatmul.mubr.bf16.gmra.mrb[24].mxu0 %v2692_v26  ;;  %1400 = vmatmul.mubr.bf16.gmra.mrb[24].mxu1 %v2692_v26  ;;  %v2447_v26 = vld [vmem:[#allocation5 + $0xb0] sm:$0xff]  }
 0x15d   :  { %1263 = vmatprep.mubr.bf16.mxu0 %v2703_v58  ;;  %1409 = vmatprep.mubr.bf16.mxu1 %v2703_v58  ;;  %v2448_v58 = vld [vmem:[#allocation5 + $0x78] sm:$0xff]  }
 0x15e   :  { %2075 = vmatpush3.bf16.msra.mxu0 %v2437_v54  ;;  %2115 = vmatpush3.bf16.msra.mxu1 %v2439_v55 }
 0x15f   :  { %2076 = vmatprep.subr.bf16.mxu0 %v2440_v56  ;;  %2116 = vmatprep.subr.bf16.mxu1 %v2442_v45 }
 0x162   :  { %2077 = vmatpush3.bf16.msra.mxu0 %v2441_v33  ;;  %2117 = vmatpush3.bf16.msra.mxu1 %v2443_v57 }
 0x163   :  { %2078 = vmatprep.subr.bf16.mxu0 %v2444_v30  ;;  %2118 = vmatprep.subr.bf16.mxu1 %v2446_v59 }
 0x164   :  { %1264 = vmatmul.mubr.bf16.gmra.mrb[28].mxu0 %v2701_v27  ;;  %1410 = vmatmul.mubr.bf16.gmra.mrb[28].mxu1 %v2701_v27  ;;  %v466_v27 = vld [vmem:[%s2801_s4] sm:$0xf] }
 0x165   :  { %v2726_v1 = vrot.slane %v466_v27, %v70_v17  ;;  %v2730_v2 = vrot.slane %v466_v27, %v78_v21  ;;  %v2734_v3 = vrot.slane %v466_v27, %v74_v19  ;;  %v2738_v4 = vrot.slane %v466_v27, %v82_v23 }
 0x166   :  { %2079 = vmatpush3.bf16.msra.mxu0 %v2445_v60  ;;  %2119 = vmatpush3.bf16.msra.mxu1 %v2447_v26 }
 0x167   :  { %2080 = vmatprep.subr.bf16.mxu0 %v2448_v58  ;;  %2120 = vmatprep.subr.bf16.mxu1 %v2450_v61 }
 0x16a   :  { %2081 = vmatpush3.bf16.msra.mxu0 %v2449_v62  ;;  %2121 = vmatpush3.bf16.msra.mxu1 %v2451_v63 }
 0x21f   :  { %v1235_v6 = vpop.f32.mrb[16].mxu0  ;;  %v1381_v5 = vpop.f32.mrb[16].mxu1 }
 0x220   :  { %v2146_v7 = vadd.f32 %v1235_v6, %v2726_v1  ;;  %v2162_v8 = vadd.f32 %v1381_v5, %v2730_v2  ;;  %v1237_v17 = vpop.f32.mrb[17].mxu0  ;;  %v1383_v9 = vpop.f32.mrb[17].mxu1 }
 0x221   :  { %v2147_v10 = vadd.f32 %v1237_v17, %v2734_v3  ;;  %v2163_v21 = vadd.f32 %v1383_v9, %v2738_v4  ;;  %v1239_v11 = vpop.f32.mrb[18].mxu0  ;;  %v1385_v12 = vpop.f32.mrb[18].mxu1 }
 0x222   :  { %v2148_v19 = vadd.f32 %v1239_v11, %v2726_v1  ;;  %v2164_v16 = vadd.f32 %v1385_v12, %v2730_v2  ;;  %v1241_v23 = vpop.f32.mrb[19].mxu0  ;;  %v1387_v13 = vpop.f32.mrb[19].mxu1  ;;  %v1420_v18 = vmax.f32 %v2146_v7, 0.0  ;;  %v1422_v24 = vmax.f32 %v2162_v8, 0.0 }
 0x223   :  { %v2149_v14 = vadd.f32 %v1241_v23, %v2734_v3  ;;  %v2165_v15 = vadd.f32 %v1387_v13, %v2738_v4  ;;  %v1421_v29 = vmax.f32 %v2147_v10, 0.0  ;;  %v1423_v31 = vmax.f32 %v2163_v21, 0.0 }
 0x224   :  { %v1424_v25 = vmax.f32 %v2148_v19, 0.0  ;;  %v1426_v28 = vmax.f32 %v2164_v16, 0.0 }
 0x225   :  { %v1425_v32 = vmax.f32 %v2149_v14, 0.0  ;;  %v1427_v34 = vmax.f32 %v2165_v15, 0.0 }
 0x226   :  { %v1452_v35 = vpack.c.bf16 %v1424_v25, %v1420_v18  ;;  %v1454_v36 = vpack.c.bf16 %v1426_v28, %v1422_v24 }
 0x227   :  { %v1453_v20 = vpack.c.bf16 %v1425_v32, %v1421_v29  ;;  %v1455_v37 = vpack.c.bf16 %v1427_v34, %v1423_v31  ;;  %v1245_v38 = vpop.f32.mrb[20].mxu0  ;;  %v1391_v39 = vpop.f32.mrb[20].mxu1 }
 0x228   :  { %v2150_v40 = vadd.f32 %v1245_v38, %v2726_v1  ;;  %v2166_v41 = vadd.f32 %v1391_v39, %v2730_v2  ;;  %v1247_v42 = vpop.f32.mrb[21].mxu0  ;;  %v1393_v43 = vpop.f32.mrb[21].mxu1 }
 0x229   :  { %v2151_v44 = vadd.f32 %v1247_v42, %v2734_v3  ;;  %v2167_v22 = vadd.f32 %v1393_v43, %v2738_v4  ;;  %v1249_v46 = vpop.f32.mrb[22].mxu0  ;;  %v1395_v47 = vpop.f32.mrb[22].mxu1  ;;  %1763 = vmatprep.mubr.bf16.mxu0 %v1453_v20  ;;  %1828 = vmatprep.mubr.bf16.mxu1 %v1455_v37 }
 0x22a   :  { %v2152_v48 = vadd.f32 %v1249_v46, %v2726_v1  ;;  %v2168_v49 = vadd.f32 %v1395_v47, %v2730_v2  ;;  %v1251_v0 = vpop.f32.mrb[23].mxu0  ;;  %v1397_v50 = vpop.f32.mrb[23].mxu1  ;;  %1764 = vmatmul.mubr.bf16.vlgmr.msra.gmra.mrb[32].mxu0 %v1452_v35  ;;  %1829 = vmatmul.mubr.bf16.vlgmr.msra.gmra.mrb[32].mxu1 %v1454_v36  ;;  %v1428_v53 = vmax.f32 %v2150_v40, 0.0  ;;  %v1430_v54 = vmax.f32 %v2166_v41, 0.0 }
 0x22b   :  { %v2153_v51 = vadd.f32 %v1251_v0, %v2734_v3  ;;  %v2169_v52 = vadd.f32 %v1397_v50, %v2738_v4  ;;  %v1429_v45 = vmax.f32 %v2151_v44, 0.0  ;;  %v1431_v33 = vmax.f32 %v2167_v22, 0.0 }
 0x22c   :  { %v1432_v55 = vmax.f32 %v2152_v48, 0.0  ;;  %v1434_v56 = vmax.f32 %v2168_v49, 0.0 }
 0x22d   :  { %v1433_v57 = vmax.f32 %v2153_v51, 0.0  ;;  %v1435_v30 = vmax.f32 %v2169_v52, 0.0 }
 0x22e   :  { %v1456_v59 = vpack.c.bf16 %v1432_v55, %v1428_v53  ;;  %v1458_v60 = vpack.c.bf16 %v1434_v56, %v1430_v54 }
 0x22f   :  { %v1457_v26 = vpack.c.bf16 %v1433_v57, %v1429_v45  ;;  %v1459_v58 = vpack.c.bf16 %v1435_v30, %v1431_v33  ;;  %v1255_v61 = vpop.f32.mrb[24].mxu0  ;;  %v1401_v62 = vpop.f32.mrb[24].mxu1 }
 0x230   :  { %v2154_v63 = vadd.f32 %v1255_v61, %v2726_v1  ;;  %v2170_v27 = vadd.f32 %v1401_v62, %v2730_v2  ;;  %v1257_v6 = vpop.f32.mrb[25].mxu0  ;;  %v1403_v5 = vpop.f32.mrb[25].mxu1 }
 0x231   :  { %v2155_v7 = vadd.f32 %v1257_v6, %v2734_v3  ;;  %v2171_v8 = vadd.f32 %v1403_v5, %v2738_v4  ;;  %v1259_v17 = vpop.f32.mrb[26].mxu0  ;;  %v1405_v9 = vpop.f32.mrb[26].mxu1  ;;  %1771 = vmatprep.mubr.bf16.mxu0 %v1457_v26  ;;  %1836 = vmatprep.mubr.bf16.mxu1 %v1459_v58 }
 0x232   :  { %v2156_v10 = vadd.f32 %v1259_v17, %v2726_v1  ;;  %v2172_v21 = vadd.f32 %v1405_v9, %v2730_v2  ;;  %v1261_v11 = vpop.f32.mrb[27].mxu0  ;;  %v1407_v12 = vpop.f32.mrb[27].mxu1  ;;  %1772 = vmatmul.mubr.bf16.gmra.mrb[36].mxu0 %v1456_v59  ;;  %1837 = vmatmul.mubr.bf16.gmra.mrb[36].mxu1 %v1458_v60  ;;  %v1436_v23 = vmax.f32 %v2154_v63, 0.0  ;;  %v1438_v13 = vmax.f32 %v2170_v27, 0.0 }
 0x233   :  { %v2157_v19 = vadd.f32 %v1261_v11, %v2734_v3  ;;  %v2173_v16 = vadd.f32 %v1407_v12, %v2738_v4  ;;  %v1437_v18 = vmax.f32 %v2155_v7, 0.0  ;;  %v1439_v24 = vmax.f32 %v2171_v8, 0.0 }
 0x234   :  { %v1440_v14 = vmax.f32 %v2156_v10, 0.0  ;;  %v1442_v15 = vmax.f32 %v2172_v21, 0.0 }
 0x235   :  { %v1441_v25 = vmax.f32 %v2157_v19, 0.0  ;;  %v1443_v28 = vmax.f32 %v2173_v16, 0.0 }
 0x236   :  { %v1460_v29 = vpack.c.bf16 %v1440_v14, %v1436_v23  ;;  %v1462_v31 = vpack.c.bf16 %v1442_v15, %v1438_v13 }
 0x237   :  { %v1461_v32 = vpack.c.bf16 %v1441_v25, %v1437_v18  ;;  %v1463_v34 = vpack.c.bf16 %v1443_v28, %v1439_v24  ;;  %v1265_v35 = vpop.f32.mrb[28].mxu0  ;;  %v1411_v36 = vpop.f32.mrb[28].mxu1 }
 0x238   :  { %v2158_v20 = vadd.f32 %v1265_v35, %v2726_v1  ;;  %v2174_v37 = vadd.f32 %v1411_v36, %v2730_v2  ;;  %v1267_v38 = vpop.f32.mrb[29].mxu0  ;;  %v1413_v39 = vpop.f32.mrb[29].mxu1 }
 0x239   :  { %v2159_v40 = vadd.f32 %v1267_v38, %v2734_v3  ;;  %v2175_v41 = vadd.f32 %v1413_v39, %v2738_v4  ;;  %v1269_v42 = vpop.f32.mrb[30].mxu0  ;;  %v1415_v43 = vpop.f32.mrb[30].mxu1  ;;  %1779 = vmatprep.mubr.bf16.mxu0 %v1461_v32  ;;  %1844 = vmatprep.mubr.bf16.mxu1 %v1463_v34 }
 0x23a   :  { %v2160_v44 = vadd.f32 %v1269_v42, %v2726_v1  ;;  %v2176_v22 = vadd.f32 %v1415_v43, %v2730_v2  ;;  %v1271_v46 = vpop.f32.mrb[31].mxu0  ;;  %v1417_v47 = vpop.f32.mrb[31].mxu1  ;;  %1780 = vmatmul.mubr.bf16.gmra.mrb[40].mxu0 %v1460_v29  ;;  %1845 = vmatmul.mubr.bf16.gmra.mrb[40].mxu1 %v1462_v31  ;;  %v1444_v0 = vmax.f32 %v2158_v20, 0.0  ;;  %v1446_v50 = vmax.f32 %v2174_v37, 0.0 }
 0x23b   :  { %v2161_v48 = vadd.f32 %v1271_v46, %v2734_v3  ;;  %v2177_v49 = vadd.f32 %v1417_v47, %v2738_v4  ;;  %v1445_v53 = vmax.f32 %v2159_v40, 0.0  ;;  %v1447_v54 = vmax.f32 %v2175_v41, 0.0  ;;  %v2775_v4 = vld [vmem:[%s2803_s6] ss:$0 sm:$0xff]  ;;  %s2531_s6 = smov [#allocation7]  }
 0x23c   :  { %v1448_v51 = vmax.f32 %v2160_v44, 0.0  ;;  %v1450_v52 = vmax.f32 %v2176_v22, 0.0  ;;  %s1874_s18 = sshll.u32 %s2531_s6, 4  ;;  %s1875_s18 = int_to_ptr.vmem [resolvable:$true] %s1874_s18 }
 0x23d   :  { %v1449_v55 = vmax.f32 %v2161_v48, 0.0  ;;  %v1451_v56 = vmax.f32 %v2177_v49, 0.0  ;;  %s2496_s19 = scalar_lea.vmem %s1875_s18, 1024  ;;  %p2501_p3 = scmp.lt.s32.totalorder %s1875_s18, %s1875_s18 }
 0x23e   :  { %v1464_v45 = vpack.c.bf16 %v1448_v51, %v1444_v0  ;;  %v1466_v1 = vpack.c.bf16 %v1450_v52, %v1446_v50  ;;  %p2497_p2 = scmp.ne.s32.totalorder %s1875_s18, %s2496_s19  ;;  %p2502_p4 = scmp.lt.s32.totalorder %s2496_s19, %s2496_s19 }
 0x23f   :  { %v1465_v33 = vpack.c.bf16 %v1449_v55, %v1445_v53  ;;  %v1467_v2 = vpack.c.bf16 %v1451_v56, %v1447_v54 }
 0x240   :  { %p2503_p5 = por %p2502_p4, %p2501_p3 }
 0x241   :  { %1787 = vmatprep.mubr.bf16.mxu0 %v1465_v33  ;;  %1852 = vmatprep.mubr.bf16.mxu1 %v1467_v2 }
 0x242   :  { %1788 = vmatmul.mubr.bf16.gmra.mrb[44].mxu0 %v1464_v45  ;;  %1853 = vmatmul.mubr.bf16.gmra.mrb[44].mxu1 %v1466_v1  ;;  %p2504_p6 = pnand %p2503_p5, %p2497_p2 }
 0x2fd   :  { %v2082_v57 = vpop.f32.mrb[32].mxu0  ;;  %v2122_v3 = vpop.f32.mrb[32].mxu1 }
 0x2fe   :  { %v2083_v30 = vpop.f32.mrb[33].mxu0  ;;  %v2123_v59 = vpop.f32.mrb[33].mxu1 }
 0x2ff   :  { %v2084_v60 = vadd.f32 %v2083_v30, %v2082_v57  ;;  %v2124_v26 = vadd.f32 %v2123_v59, %v2122_v3  ;;  %v2085_v58 = vpop.f32.mrb[34].mxu0  ;;  %v2125_v61 = vpop.f32.mrb[34].mxu1 }
 0x300   :  { %v2086_v62 = vpop.f32.mrb[35].mxu0  ;;  %v2126_v63 = vpop.f32.mrb[35].mxu1 }
 0x301   :  { %v1766_v27 = vadd.f32 %v2084_v60, %v2775_v4  ;;  %v2087_v6 = vadd.f32 %v2086_v62, %v2085_v58  ;;  %v2127_v5 = vadd.f32 %v2126_v63, %v2125_v61 }
 0x303   :  { %v1831_v7 = vadd.f32 %v2124_v26, %v1766_v27  ;;  %v1769_v8 = vadd.f32 %v2087_v6, %v2775_v4 }
 0x305   :  { %1861 = vst [vmem:[#allocation7] sm:$0xff] %v1831_v7  ;;  %v1834_v17 = vadd.f32 %v2127_v5, %v1769_v8  ;;  %v2088_v9 = vpop.f32.mrb[36].mxu0  ;;  %v2128_v10 = vpop.f32.mrb[36].mxu1 }
 0x306   :  { %v2089_v21 = vpop.f32.mrb[37].mxu0  ;;  %v2129_v11 = vpop.f32.mrb[37].mxu1 }
 0x307   :  { %1862 = vst [vmem:[#allocation7 + $0x8] sm:$0xff] %v1834_v17  ;;  %v2090_v12 = vadd.f32 %v2089_v21, %v2088_v9  ;;  %v2130_v19 = vadd.f32 %v2129_v11, %v2128_v10  ;;  %v2091_v16 = vpop.f32.mrb[38].mxu0  ;;  %v2131_v23 = vpop.f32.mrb[38].mxu1 }
 0x308   :  { %v2092_v13 = vpop.f32.mrb[39].mxu0  ;;  %v2132_v14 = vpop.f32.mrb[39].mxu1 }
 0x309   :  { %v1774_v15 = vadd.f32 %v2090_v12, %v2775_v4  ;;  %v2093_v18 = vadd.f32 %v2092_v13, %v2091_v16  ;;  %v2133_v24 = vadd.f32 %v2132_v14, %v2131_v23 }
 0x30b   :  { %v1839_v25 = vadd.f32 %v2130_v19, %v1774_v15  ;;  %v1777_v28 = vadd.f32 %v2093_v18, %v2775_v4 }
 0x30d   :  { %1863 = vst [vmem:[#allocation7 + $0x10] sm:$0xff] %v1839_v25  ;;  %v1842_v29 = vadd.f32 %v2133_v24, %v1777_v28  ;;  %v2094_v31 = vpop.f32.mrb[40].mxu0  ;;  %v2134_v32 = vpop.f32.mrb[40].mxu1 }
 0x30e   :  { %v2095_v34 = vpop.f32.mrb[41].mxu0  ;;  %v2135_v35 = vpop.f32.mrb[41].mxu1 }
 0x30f   :  { %1864 = vst [vmem:[#allocation7 + $0x18] sm:$0xff] %v1842_v29  ;;  %v2096_v36 = vadd.f32 %v2095_v34, %v2094_v31  ;;  %v2136_v20 = vadd.f32 %v2135_v35, %v2134_v32  ;;  %v2097_v37 = vpop.f32.mrb[42].mxu0  ;;  %v2137_v38 = vpop.f32.mrb[42].mxu1 }
 0x310   :  { %v2098_v39 = vpop.f32.mrb[43].mxu0  ;;  %v2138_v40 = vpop.f32.mrb[43].mxu1 }
 0x311   :  { %v1782_v41 = vadd.f32 %v2096_v36, %v2775_v4  ;;  %v2099_v42 = vadd.f32 %v2098_v39, %v2097_v37  ;;  %v2139_v43 = vadd.f32 %v2138_v40, %v2137_v38 }
 0x313   :  { %v1847_v44 = vadd.f32 %v2136_v20, %v1782_v41  ;;  %v1785_v22 = vadd.f32 %v2099_v42, %v2775_v4 }
 0x315   :  { %1865 = vst [vmem:[#allocation7 + $0x20] sm:$0xff] %v1847_v44  ;;  %v1850_v46 = vadd.f32 %v2139_v43, %v1785_v22  ;;  %v2100_v47 = vpop.f32.mrb[44].mxu0  ;;  %v2140_v48 = vpop.f32.mrb[44].mxu1 }
 0x316   :  { %v2101_v49 = vpop.f32.mrb[45].mxu0  ;;  %v2141_v0 = vpop.f32.mrb[45].mxu1 }
 0x317   :  { %1866 = vst [vmem:[#allocation7 + $0x28] sm:$0xff] %v1850_v46  ;;  %v2102_v50 = vadd.f32 %v2101_v49, %v2100_v47  ;;  %v2142_v51 = vadd.f32 %v2141_v0, %v2140_v48  ;;  %v2103_v52 = vpop.f32.mrb[46].mxu0  ;;  %v2143_v53 = vpop.f32.mrb[46].mxu1 }
 0x318   :  { %v2104_v54 = vpop.f32.mrb[47].mxu0  ;;  %v2144_v55 = vpop.f32.mrb[47].mxu1 }
 0x319   :  { %v1790_v56 = vadd.f32 %v2102_v50, %v2775_v4  ;;  %v2105_v45 = vadd.f32 %v2104_v54, %v2103_v52  ;;  %v2145_v1 = vadd.f32 %v2144_v55, %v2143_v53 }
 0x31b   :  { %v1855_v33 = vadd.f32 %v2142_v51, %v1790_v56  ;;  %v1793_v2 = vadd.f32 %v2105_v45, %v2775_v4 }
 0x31d   :  { %1867 = vst [vmem:[#allocation7 + $0x30] sm:$0xff] %v1855_v33  ;;  %v1858_v57 = vadd.f32 %v2145_v1, %v1793_v2 }
 0x31f   :  { %1868 = vst [vmem:[#allocation7 + $0x38] sm:$0xff] %v1858_v57 }
 0x320   :  { %2507 = shalt.err (!%p2504_p6)
}
 0x321   :  { %s2508_s22 = scalar_lea.hbm %s2804_s7, 1024 }
 0x322   :  { %p2509_p7 = scmp.ne.s32.totalorder %s2804_s7, %s2508_s22  ;;  %p2512_p8 = scmp.lt.u32.totalorder %s2508_s22, %s2804_s7 }
 0x324   :  { %p2514_p9 = pnand %p2512_p8, %p2509_p7 }
 0x326   :  { %2517 = shalt.err (!%p2514_p9)
}
 0x327   :  { %s2532_s26 = smov 128   ;;  %s2533_s27 = smov 8  }
 0x328   :  { %1880 = dma.vmem_to_hbm [thread:$0]  %s1875_s18, 1024, %s2804_s7, [#allocation4], %s2532_s26, %s2532_s26, %s2533_s27  }
 0x329   :  { %2522 = dma.done.wait [#allocation4], 1024  }
 0x32a   :  { %2523 = vsyncadd [#allocation4], 4294966272 }
 0x32b   :  { %1884 = vsyncpa [#allocation3], 1 }
 0x32c   :  { %1885 = vsyncpa [#allocation6], 1 }
 0x32d   :  { %1886 = vsyncpa [#allocation4], 1 }

</bundles_post_ra>
